<compile_context>
chip_gen: v6e
topology: v6e:2x2x1
jax: 0.10.0
libtpu: 0.0.40
codegen_flags: <defaults>
</compile_context>

<pallas_src>
import functools
import math

import jax
import jax.numpy as jnp
from jax.experimental import pallas as pl
from jax.experimental.pallas import tpu as pltpu


def _visibility_kernel(coords_ref, masks_ref, *, width, height, coord_type,
                       channels):
    """coords_ref / masks_ref: dense (tile_rows, 128) VMEM blocks of the flat
    element stream; element at flat index f belongs to channel f % channels."""
    rows, lanes = coords_ref.shape
    out_dtype = masks_ref.dtype
    w = float(width)
    h = float(height)

    lane = jax.lax.broadcasted_iota(jnp.int32, (rows, lanes), 1)
    if lanes % channels == 0:
        # Row starts (multiples of 128) are channel-aligned -> lane-only pattern.
        ch = lane % channels
    else:
        row = jax.lax.broadcasted_iota(jnp.int32, (rows, lanes), 0)
        base = pl.program_id(0) * (rows * lanes)
        ch = (base + row * lanes + lane) % channels

    is_x = ch == 0
    # Per-element bound: width for channel 0, height otherwise (channels >= 2
    # are masked out below, so their bound value is irrelevant).
    size = jnp.where(is_x, w, h)

    # Compute in f32 (v5e has no bf16 VALU; exact for f32 inputs).
    v = coords_ref[...].astype(jnp.float32)
    if coord_type == 'ndc':
        v = (v + 1.0) * 0.5 * size
    elif coord_type != 'coord':            # 'norm' / anything else -> normalized
        v = v * size

    vis = jnp.logical_and(v >= 0.0, v < size)
    if channels > 2:
        vis = jnp.logical_and(vis, ch < 2)  # extra channels stay zero

    masks_ref[...] = vis.astype(out_dtype)  # single full-block store


def _jnp_forward(coords, *, width, height, coord_type):
    """Pure-jnp forward (reference + small-input fast path)."""
    c = coords.astype(jnp.float32)
    x, y = c[..., 0], c[..., 1]
    if coord_type == 'ndc':
        x = (x + 1.0) / 2.0 * width
        y = (y + 1.0) / 2.0 * height
    elif coord_type != 'coord':
        x = x * width
        y = y * height
    masks = jnp.zeros_like(coords)
    masks = masks.at[..., 0].set(
        jnp.logical_and(x >= 0, x < width).astype(coords.dtype))
    masks = masks.at[..., 1].set(
        jnp.logical_and(y >= 0, y < height).astype(coords.dtype))
    return masks


def _pick_tile_rows(rows, max_tile_rows, min_grid_steps=8):
    """Tile rows: multiple of 8, <= max_tile_rows, aiming for >= min_grid_steps
    grid steps; falls back to the full extent for small inputs."""
    if rows <= 8:
        return rows                                    # full extent, 1 step
    t = -(-rows // min_grid_steps)                     # ceil(rows / steps)
    t = ((t + 7) // 8) * 8                             # multiple of 8
    t = max(8, min(t, max_tile_rows))
    return rows if t >= rows else t


def visibility_fov(coords, *, width=1, height=1, coord_type='coord',
                   max_tile_rows=4096, use_pallas=None):
    """JAX/Pallas equivalent of VisibilityFOV.forward."""
    orig_shape = coords.shape
    C = orig_shape[-1]
    assert C >= 2, "VisibilityFOV expects at least 2 coordinate channels"
    T = math.prod(orig_shape)                          # total elements

    # Fast path: pallas_call/DMA setup overhead dwarfs the work for tiny inputs.
    if use_pallas is None:
        use_pallas = T >= 16384
    if not use_pallas:
        return _jnp_forward(coords, width=width, height=height,
                            coord_type=coord_type)

    # Flat, layout-preserving view of the element stream; pad only to the next
    # multiple of 128 lanes (at most 127 extra elements).
    flat = coords.reshape(-1)
    rows = (T + 127) // 128
    t_pad = rows * 128
    if t_pad != T:
        flat = jnp.pad(flat, (0, t_pad - T))
    slab = flat.reshape(rows, 128)                     # dense (rows, 128)

    tile_rows = _pick_tile_rows(rows, max_tile_rows)   # ~2 MiB/buffer max (f32)
    grid = (pl.cdiv(rows, tile_rows),)                 # ragged last block masked

    kernel = functools.partial(_visibility_kernel, width=width, height=height,
                               coord_type=coord_type, channels=C)

    out = pl.pallas_call(
        kernel,
        out_shape=jax.ShapeDtypeStruct((rows, 128), coords.dtype),
        grid_spec=pltpu.PrefetchScalarGridSpec(
            num_scalar_prefetch=0,
            grid=grid,
            in_specs=[pl.BlockSpec((tile_rows, 128), lambda i: (i, 0))],
            out_specs=pl.BlockSpec((tile_rows, 128), lambda i: (i, 0)),
        ),
        compiler_params=pltpu.CompilerParams(
            dimension_semantics=("parallel",),
            vmem_limit_bytes=32 * 1024 * 1024,
        ),
    )(slab)

    # Drop padded tail (which may hold spurious 1s) and restore original shape.
    return out.reshape(-1)[:T].reshape(orig_shape)


if __name__ == "__main__":
    key = jax.random.PRNGKey(0)

    tests = [
        # (shape,         width, height, coord_type)
        ((2, 8, 2),       16,    16,     'ndc'),    # keypoint-sized, single block
        ((4, 700, 3),     64,    32,     'norm'),   # C=3 general channel path + ragged block
        ((3, 5, 2),        8,     8,     'coord'),  # raw pixel coords
        ((2, 2048, 2),    32,    24,     'ndc'),    # multi-step grid, lane-periodic path
    ]

    for i, (shape, w, h, ct) in enumerate(tests):
        key, sub = jax.random.split(key)
        coords = jax.random.uniform(sub, shape, jnp.float32,
                                    minval=-1.5, maxval=1.5)
        masks = visibility_fov(coords, width=w, height=h, coord_type=ct,
                               use_pallas=True)
        jax.block_until_ready(masks)

        ref = _jnp_forward(coords, width=w, height=h, coord_type=ct)
        assert masks.shape == coords.shape and masks.dtype == coords.dtype
        assert bool(jnp.all(masks == ref)), f"Pallas mismatch vs reference (test {i})"

    # Auto path: tiny input routes to the pure-jnp fast path.
    key, sub = jax.random.split(key)
    small = jax.random.uniform(sub, (2, 8, 2), jnp.float32,
                               minval=-1.5, maxval=1.5)
    fp = visibility_fov(small, width=16, height=16, coord_type='ndc')
    jax.block_until_ready(fp)
    assert bool(jnp.all(fp == _jnp_forward(small, width=16, height=16,
                                           coord_type='ndc')))

    print("KERNEL_OK")
</pallas_src>

<mosaic_0001>
module attributes {stable_mosaic.version = 11 : i64} {
  func.func @_visibility_kernel(%arg0: i32, %arg1: memref<1x128xf32, #tpu.memory_space<vmem>>, %arg2: memref<1x128xf32, #tpu.memory_space<vmem>>) attributes {dimension_semantics = [#tpu.dimension_semantics<parallel>], iteration_bounds = array<i64: 1>, scalar_prefetch = 0 : i64, scratch_operands = 0 : i64, tpu.core_type = #tpu.core_type<tc>, window_params = [{transform_indices = @transform_0, window_bounds = array<i64: 1, 128>}, {transform_indices = @transform_1, window_bounds = array<i64: 1, 128>}]} {
    %0 = tpu.iota {dimensions = array<i32: 1>} : vector<1x128xi32>
    %c2_i32 = arith.constant 2 : i32
    %c0_i32 = arith.constant 0 : i32
    %1 = arith.cmpi eq, %c2_i32, %c0_i32 : i32
    %c1_i32 = arith.constant 1 : i32
    %2 = arith.select %1, %c1_i32, %c2_i32 : i32
    %3 = vector.broadcast %2 : i32 to vector<1x128xi32>
    %4 = arith.remsi %0, %3 : vector<1x128xi32>
    %c0_i32_0 = arith.constant 0 : i32
    %5 = vector.broadcast %c0_i32_0 : i32 to vector<1x128xi32>
    %6 = arith.cmpi ne, %4, %5 : vector<1x128xi32>
    %c0_i32_1 = arith.constant 0 : i32
    %7 = vector.broadcast %c0_i32_1 : i32 to vector<1x128xi32>
    %8 = arith.cmpi slt, %4, %7 : vector<1x128xi32>
    %c0_i32_2 = arith.constant 0 : i32
    %9 = arith.cmpi slt, %2, %c0_i32_2 : i32
    %10 = vector.broadcast %9 : i1 to vector<1x128xi1>
    %11 = vector.broadcast %10 : vector<1x128xi1> to vector<1x128xi1>
    %12 = arith.xori %8, %11 : vector<1x128xi1>
    %13 = arith.andi %12, %6 : vector<1x128xi1>
    %14 = vector.broadcast %2 : i32 to vector<1x128xi32>
    %15 = arith.addi %4, %14 : vector<1x128xi32>
    %16 = arith.select %13, %15, %4 : vector<1x128xi1>, vector<1x128xi32>
    %c0_i32_3 = arith.constant 0 : i32
    %17 = vector.broadcast %c0_i32_3 : i32 to vector<1x128xi32>
    %18 = arith.cmpi eq, %16, %17 : vector<1x128xi32>
    %cst = arith.constant 1.600000e+01 : f32
    %cst_4 = arith.constant 1.600000e+01 : f32
    %19 = vector.broadcast %cst : f32 to vector<1x128xf32>
    %20 = vector.broadcast %cst_4 : f32 to vector<1x128xf32>
    %21 = arith.select %18, %19, %20 : vector<1x128xi1>, vector<1x128xf32>
    %c0 = arith.constant 0 : index
    %c0_5 = arith.constant 0 : index
    %22 = vector.load %arg1[%c0, %c0_5] : memref<1x128xf32, #tpu.memory_space<vmem>>, vector<1x128xf32>
    %cst_6 = arith.constant 1.000000e+00 : f32
    %23 = vector.broadcast %cst_6 : f32 to vector<1x128xf32>
    %24 = arith.addf %22, %23 : vector<1x128xf32>
    %cst_7 = arith.constant 5.000000e-01 : f32
    %25 = vector.broadcast %cst_7 : f32 to vector<1x128xf32>
    %26 = arith.mulf %24, %25 : vector<1x128xf32>
    %27 = arith.mulf %26, %21 : vector<1x128xf32>
    %cst_8 = arith.constant 0.000000e+00 : f32
    %28 = vector.broadcast %cst_8 : f32 to vector<1x128xf32>
    %29 = arith.cmpf oge, %27, %28 : vector<1x128xf32>
    %30 = arith.cmpf olt, %27, %21 : vector<1x128xf32>
    %31 = arith.andi %29, %30 : vector<1x128xi1>
    %32 = arith.extui %31 : vector<1x128xi1> to vector<1x128xi32>
    %33 = arith.sitofp %32 : vector<1x128xi32> to vector<1x128xf32>
    %c0_9 = arith.constant 0 : index
    %c0_10 = arith.constant 0 : index
    %34 = vector.load %arg2[%c0_9, %c0_10] : memref<1x128xf32, #tpu.memory_space<vmem>>, vector<1x128xf32>
    tpu.vector_store %arg2[%c0_9, %c0_10], %33 {strides = array<i32>} : memref<1x128xf32, #tpu.memory_space<vmem>>, vector<1x128xf32>,
    return
  }
  func.func @transform_0(%arg0: i32) -> (i32, i32) {
    %c0_i32 = arith.constant 0 : i32
    %c0_i32_0 = arith.constant 0 : i32
    return %arg0, %c0_i32 : i32, i32
  }
  func.func @transform_1(%arg0: i32) -> (i32, i32) {
    %c0_i32 = arith.constant 0 : i32
    %c0_i32_0 = arith.constant 0 : i32
    return %arg0, %c0_i32 : i32, i32
  }
}

</mosaic_0001>

<bundles_post_ra>
// kernel: tpu_custom_call.1
= control target key start
LH: loop header
LB: loop body
LE: loop exit
PB: predicated region body
PF: predicated region fallthrough
CT: control target
= control target key end

     0   :  { %6 = vsyncpa [#allocation3], 0  ;;  %s113_s0 = inlined_call_operand.hbm [shape: f32[1,128], index: 0, kind: input, shape index: {}]   ;;  %s114_s1 = inlined_call_operand.hbm [shape: f32[1,128], index: 1, kind: output, shape index: {}]  }
   0x1   :  { %7 = vsyncpa [#allocation4], 0  ;;  %s94_s6 = smov [#allocation2]  }
   0x2   :  { %s14_s7 = sshll.u32 %s94_s6, 4  ;;  %s15_s7 = int_to_ptr.vmem [resolvable:$true] %s14_s7 }
   0x3   :  { %s58_s8 = scalar_lea.vmem %s15_s7, 16  ;;  %s62_s9 = scalar_lea.vmem %s15_s7, 32 }
   0x4   :  { %p59_p0 = scmp.ne.s32.totalorder %s15_s7, %s58_s8  ;;  %p63_p1 = scmp.lt.s32.totalorder %s15_s7, %s15_s7 }
   0x5   :  { %p64_p2 = scmp.lt.s32.totalorder %s62_s9, %s58_s8 }
   0x7   :  { %p65_p3 = por %p64_p2, %p63_p1 }
   0x9   :  { %p66_p4 = pnand %p65_p3, %p59_p0 }
   0xb   :  { %69 = shalt.err (!%p66_p4)
}
   0xc   :  { %17 = dma.hbm_to_vmem [thread:$0]  %s113_s0, 16, %s15_s7, [#allocation3]  }
   0xd   :  { %90 = dma.done.wait [#allocation3], 16  }
   0xe   :  { %91 = vsyncadd [#allocation3], 4294967280  ;;  %v21_v0 = vld [vmem:[#allocation2] sm:$0x1]  ;;  %s95_s12 = smov [#allocation5]   ;;  %v96_v4 = vmov 0.0  }
   0xf   :  { %v22_v1 = vadd.f32 1.0, %v21_v0  ;;  %s37_s13 = sshll.u32 %s95_s12, 4  ;;  %s38_s13 = int_to_ptr.vmem [resolvable:$true] %s37_s13 }
  0x10   :  { %s70_s14 = scalar_lea.vmem %s38_s13, 16  ;;  %s74_s15 = scalar_lea.vmem %s38_s13, 32 }
  0x11   :  { %v23_v2 = vmul.f32 0.5, %v22_v1  ;;  %p71_p5 = scmp.ne.s32.totalorder %s38_s13, %s70_s14  ;;  %p75_p6 = scmp.lt.s32.totalorder %s38_s13, %s38_s13 }
  0x12   :  { %p76_p7 = scmp.lt.s32.totalorder %s74_s15, %s70_s14 }
  0x13   :  { %v24_v3 = vmul.f32 16.0, %v23_v2 }
  0x14   :  { %p77_p8 = por %p76_p7, %p75_p6 }
  0x15   :  { %vm25_vm0 = vcmp.ge.f32.partialorder %v24_v3, 0.0  ;;  %vm26_vm1 = vcmp.lt.f32.partialorder %v24_v3, 16.0 }
  0x16   :  { %vm27_vm2 = vmand %vm25_vm0, %vm26_vm1  ;;  %p78_p9 = pnand %p77_p8, %p71_p5 }
  0x17   :  { %v46_v5 = vsel %vm27_vm2, 1.0, %v96_v4 }
  0x18   :  { %30 = vst [vmem:[#allocation5] sm:$0x1] %v46_v5 }
  0x19   :  { %81 = shalt.err (!%p78_p9)
}
  0x1a   :  { %40 = dma.vmem_to_hbm [thread:$0]  %s38_s13, 16, %s114_s1, [#allocation4]  }
  0x1b   :  { %92 = dma.done.wait [#allocation4], 16  }
  0x1c   :  { %93 = vsyncadd [#allocation4], 4294967280 }
  0x1d   :  { %44 = vsyncpa [#allocation3], 1 }
  0x1e   :  { %45 = vsyncpa [#allocation4], 1 }

</bundles_post_ra>
